<compile_context>
chip_gen: v6e
topology: v6e:2x2x1
jax: 0.10.0
libtpu: 0.0.40
codegen_flags: <defaults>
</compile_context>

<pallas_src>
import jax
import jax.numpy as jnp
from jax.experimental import pallas as pl
from jax.experimental.pallas import tpu as pltpu

LAM = 1.0          # self.lam = 1 in the PyTorch module
LEAKY_SLOPE = 0.2  # slope of the synthetic discriminator's LeakyReLU


def _make_prior_loss_kernel(tk, D):
    """Build the kernel body for a given (static) D-tile size."""
    single_step = (tk == D)
    lane_aligned = (tk % 128 == 0)

    def kernel(x_ref, w1_ref, b1_ref, w2_ref, b2_ref, o_ref, acc_ref):
        # x:  (B, D) resident      w1 tile: (tk, HID) bf16   b1: (1, HID)
        # w2: (1, HID) row         b2: (1, 1) SMEM           o: (1, 1) SMEM
        # acc: (B, HID) f32 scratch (hidden pre-activation accumulator)
        k = pl.program_id(0)

        @pl.when(k == 0)
        def _init():
            acc_ref[...] = jnp.zeros_like(acc_ref)

        # Partial first-layer matmul for this D-tile (bf16 MXU, f32 accum).
        if single_step:
            x_blk = x_ref[...]
        else:
            start = k * tk
            if lane_aligned:
                start = pl.multiple_of(start, 128)
            x_blk = x_ref[:, pl.ds(start, tk)]
        acc_ref[...] += jnp.dot(x_blk.astype(jnp.bfloat16), w1_ref[...],
                                preferred_element_type=jnp.float32)

        @pl.when(k == pl.num_programs(0) - 1)
        def _epilogue():
            h = acc_ref[...] + b1_ref[...]                   # (B, HID)
            h = jnp.where(h > 0, h, LEAKY_SLOPE * h)         # LeakyReLU(0.2)
            # Second layer (HID -> 1): VPU multiply + cross-lane reduce.
            logits = (jnp.sum(h * w2_ref[...], axis=-1, keepdims=True)
                      + b2_ref[0, 0])
            # l_p = lam * log(1 - sigmoid(z)) == -lam * softplus(z)  (stable)
            z = logits
            softplus = jnp.maximum(z, 0.0) + jnp.log1p(jnp.exp(-jnp.abs(z)))
            o_ref[0, 0] = jnp.mean(-LAM * softplus)

    return kernel


def _vmem_budget_bytes():
    """Generation-aware per-step VMEM budget (conservative, fits v7x 64 MiB)."""
    try:
        cap = pltpu.get_tpu_info().vmem_capacity_bytes
    except Exception:
        cap = 64 * 1024 * 1024  # assume worst case (v7x) if query unavailable
    return min(cap // 2, 24 * 1024 * 1024)


def _choose_tk(D, B, HID, budget_bytes):
    """Largest legal D-tile whose per-step footprint fits the VMEM budget.

    footprint(tk) = 2*tk*HID*2  (w1 bf16 double-buffer, the only pipelined stream)
                  + B*D*4       (x resident)
                  + B*HID*4     (accumulator)
                  + 2*HID*4     (b1, w2 rows)
    Fewer grid steps is strictly better here (per-step overhead dominates),
    so take the biggest tk that fits; single step if possible.
    """
    fixed = B * D * 4 + B * HID * 4 + 2 * HID * 4
    avail = budget_bytes - fixed
    if D % 128 != 0 or avail <= 0:
        return D                      # irregular D (or tiny budget): one step
    max_tk = max(128, (avail // (2 * HID * 2)) // 128 * 128)
    if max_tk >= D:
        return D                      # whole reduction in a single grid step
    best, t = 128, 128
    while t <= min(D, max_tk):
        if D % t == 0:
            best = t
        t += 128
    return best


def prior_loss(generated_nchw, w1, b1, w2, b2, *, tk=None):
    """generated_nchw: [B, C, H, W]. Returns scalar prior loss."""
    B = generated_nchw.shape[0]
    x = generated_nchw.reshape(B, -1)          # [B, D]; no HBM dtype rewrite
    D = x.shape[1]
    HID = w1.shape[1]

    if w1.dtype != jnp.bfloat16:
        w1 = w1.astype(jnp.bfloat16)           # one-time weight prep
    b1 = b1.reshape(1, HID).astype(jnp.float32)
    w2_row = w2.reshape(1, HID).astype(jnp.float32)
    b2 = b2.reshape(1, 1).astype(jnp.float32)

    budget = _vmem_budget_bytes()
    # TODO(synk): if B*D*4 ever exceeds the VMEM budget, fall back to tiling x
    # over D as well; for this module's sizes x is a few KB and stays resident.
    if tk is None:
        tk = _choose_tk(D, B, HID, budget)
    assert D % tk == 0, f"tile {tk} must divide D={D}"
    grid = (D // tk,)

    # TODO(synk): on v7x (2 TensorCores), split the D reduction with a leading
    # size-2 "parallel" axis into per-core (B, HID) partial accumulators and a
    # tiny follow-up combine (the nonlinearity prevents merging losses directly).
    out = pl.pallas_call(
        _make_prior_loss_kernel(tk, D),
        out_shape=jax.ShapeDtypeStruct((1, 1), jnp.float32),
        grid=grid,
        in_specs=[
            pl.BlockSpec((B, D), lambda k: (0, 0)),       # x fully resident
            pl.BlockSpec((tk, HID), lambda k: (k, 0)),    # w1 D-tile (bf16 stream)
            pl.BlockSpec((1, HID), lambda k: (0, 0)),     # b1 (resident)
            pl.BlockSpec((1, HID), lambda k: (0, 0)),     # w2 as row (resident)
            pl.BlockSpec(memory_space=pltpu.SMEM),        # b2 scalar
        ],
        out_specs=pl.BlockSpec(memory_space=pltpu.SMEM),  # (1,1) scalar out
        scratch_shapes=[pltpu.VMEM((B, HID), jnp.float32)],
        compiler_params=pltpu.CompilerParams(
            dimension_semantics=("arbitrary",),           # D axis is a reduction
            vmem_limit_bytes=32 * 1024 * 1024),           # raise v5e's 16 MiB default
    )(x, w1, b1, w2_row, b2)
    return out[0, 0]


def reference_prior_loss(generated_nchw, w1, b1, w2, b2):
    """Pure-JAX reference (matches the kernel's bf16-weight path)."""
    B = generated_nchw.shape[0]
    x = generated_nchw.reshape(B, -1)
    h = jnp.dot(x.astype(jnp.bfloat16), w1.astype(jnp.bfloat16),
                preferred_element_type=jnp.float32) + b1.reshape(1, -1)
    h = jnp.where(h > 0, h, LEAKY_SLOPE * h)
    logits = h @ w2.reshape(-1, 1).astype(jnp.float32) + b2.reshape(1, 1)
    validity = jax.nn.sigmoid(logits)
    return jnp.mean(LAM * jnp.log(1.0 - validity))


if __name__ == "__main__":
    key = jax.random.PRNGKey(0)
    kx, kw1, kb1, kw2, kb2 = jax.random.split(key, 5)

    # Small NCHW "generated" batch: B=2, C=4, H=W=16  ->  D = 1024
    B, C, H, W = 2, 4, 16, 16
    D = C * H * W
    HID = 64

    generated = jax.random.normal(kx, (B, C, H, W), dtype=jnp.float32)

    # Deterministic synthetic discriminator weights (small scale so sigmoid
    # stays well inside (0, 1)).
    w1 = 0.02 * jax.random.normal(kw1, (D, HID), dtype=jnp.float32)
    b1 = 0.01 * jax.random.normal(kb1, (1, HID), dtype=jnp.float32)
    w2 = 0.02 * jax.random.normal(kw2, (HID, 1), dtype=jnp.float32)
    b2 = 0.01 * jax.random.normal(kb2, (1, 1), dtype=jnp.float32)

    ref = jax.block_until_ready(reference_prior_loss(generated, w1, b1, w2, b2))

    # Default path: VMEM-budget-derived tk -> a single grid step at this size.
    loss = jax.block_until_ready(prior_loss(generated, w1, b1, w2, b2))
    assert jnp.isfinite(loss), "loss is not finite"
    assert jnp.allclose(loss, ref, rtol=1e-4, atol=1e-4), (loss, ref)

    # Forced multi-step path (tk=256 -> 4 steps): exercises the init/accumulate/
    # epilogue pipeline for correctness; the default path above is the fast one.
    loss_multi = jax.block_until_ready(
        prior_loss(generated, w1, b1, w2, b2, tk=256))
    assert jnp.isfinite(loss_multi), "multi-step loss is not finite"
    assert jnp.allclose(loss_multi, ref, rtol=1e-4, atol=1e-4), (loss_multi, ref)

    print("KERNEL_OK")
</pallas_src>

<mosaic_0001>
module attributes {stable_mosaic.version = 11 : i64} {
  func.func @kernel(%arg0: i32, %arg1: memref<2x1024xf32, #tpu.memory_space<vmem>>, %arg2: memref<1024x64xbf16, #tpu.memory_space<vmem>>, %arg3: memref<1x64xf32, #tpu.memory_space<vmem>>, %arg4: memref<1x64xf32, #tpu.memory_space<vmem>>, %arg5: memref<1x1xf32, #tpu.memory_space<smem>>, %arg6: memref<1x1xf32, #tpu.memory_space<smem>>, %arg7: memref<2x64xf32, #tpu.memory_space<vmem>>) attributes {dimension_semantics = [#tpu.dimension_semantics<arbitrary>], iteration_bounds = array<i64: 1>, scalar_prefetch = 0 : i64, scratch_operands = 1 : i64, tpu.core_type = #tpu.core_type<tc>, window_params = [{pipeline_mode = #tpu.pipeline_mode<synchronous>, transform_indices = @transform_0, window_bounds = array<i64: 2, 1024>}, {transform_indices = @transform_1, window_bounds = array<i64: 1024, 64>}, {pipeline_mode = #tpu.pipeline_mode<synchronous>, transform_indices = @transform_2, window_bounds = array<i64: 1, 64>}, {pipeline_mode = #tpu.pipeline_mode<synchronous>, transform_indices = @transform_3, window_bounds = array<i64: 1, 64>}, {transform_indices = @transform_4, window_bounds = array<i64: 1, 1>}, {transform_indices = @transform_5, window_bounds = array<i64: 1, 1>}]} {
    %c0_i32 = arith.constant 0 : i32
    %0 = arith.cmpi eq, %arg0, %c0_i32 : i32
    %1 = arith.extui %0 : i1 to i32
    %c0_i32_0 = arith.constant 0 : i32
    %2 = arith.cmpi ne, %1, %c0_i32_0 : i32
    scf.if %2 {
      %cst_10 = arith.constant 0.000000e+00 : f32
      %13 = vector.broadcast %cst_10 : f32 to vector<2x64xf32>
      %c0_11 = arith.constant 0 : index
      %c0_12 = arith.constant 0 : index
      %14 = vector.load %arg7[%c0_11, %c0_12] : memref<2x64xf32, #tpu.memory_space<vmem>>, vector<2x64xf32>
      tpu.vector_store %arg7[%c0_11, %c0_12], %13 {strides = array<i32>} : memref<2x64xf32, #tpu.memory_space<vmem>>, vector<2x64xf32>,
    } else {
    }
    %c0 = arith.constant 0 : index
    %c0_1 = arith.constant 0 : index
    %3 = vector.load %arg1[%c0, %c0_1] : memref<2x1024xf32, #tpu.memory_space<vmem>>, vector<2x1024xf32>
    %c0_2 = arith.constant 0 : index
    %c0_3 = arith.constant 0 : index
    %4 = vector.load %arg7[%c0_2, %c0_3] : memref<2x64xf32, #tpu.memory_space<vmem>>, vector<2x64xf32>
    %5 = arith.truncf %3 : vector<2x1024xf32> to vector<2x1024xbf16>
    %c0_4 = arith.constant 0 : index
    %c0_5 = arith.constant 0 : index
    %6 = vector.load %arg2[%c0_4, %c0_5] : memref<1024x64xbf16, #tpu.memory_space<vmem>>, vector<1024x64xbf16>
    %cst = arith.constant dense<0.000000e+00> : vector<2x64xf32>
    %7 = tpu.matmul %5, %6, %cst {dimension_numbers = #tpu.dot_dimension_numbers<[1], [0], [0], [1], [0, 0, 1, 1], [], []>} : vector<2x1024xbf16>, vector<1024x64xbf16>, vector<2x64xf32> -> vector<2x64xf32>
    %8 = arith.addf %4, %7 : vector<2x64xf32>
    %c0_6 = arith.constant 0 : index
    %c0_7 = arith.constant 0 : index
    %9 = vector.load %arg7[%c0_6, %c0_7] : memref<2x64xf32, #tpu.memory_space<vmem>>, vector<2x64xf32>
    tpu.vector_store %arg7[%c0_6, %c0_7], %8 {strides = array<i32>} : memref<2x64xf32, #tpu.memory_space<vmem>>, vector<2x64xf32>,
    %c0_i32_8 = arith.constant 0 : i32
    %10 = arith.cmpi eq, %arg0, %c0_i32_8 : i32
    %11 = arith.extui %10 : i1 to i32
    %c0_i32_9 = arith.constant 0 : i32
    %12 = arith.cmpi ne, %11, %c0_i32_9 : i32
    scf.if %12 {
      %c0_10 = arith.constant 0 : index
      %c0_11 = arith.constant 0 : index
      %13 = vector.load %arg7[%c0_10, %c0_11] : memref<2x64xf32, #tpu.memory_space<vmem>>, vector<2x64xf32>
      %c0_12 = arith.constant 0 : index
      %c0_13 = arith.constant 0 : index
      %14 = vector.load %arg3[%c0_12, %c0_13] : memref<1x64xf32, #tpu.memory_space<vmem>>, vector<1x64xf32>
      %15 = vector.broadcast %14 : vector<1x64xf32> to vector<2x64xf32>
      %16 = arith.addf %13, %15 : vector<2x64xf32>
      %cst_14 = arith.constant 0.000000e+00 : f32
      %17 = vector.broadcast %cst_14 : f32 to vector<2x64xf32>
      %18 = arith.cmpf ogt, %16, %17 : vector<2x64xf32>
      %cst_15 = arith.constant 2.000000e-01 : f32
      %19 = vector.broadcast %cst_15 : f32 to vector<2x64xf32>
      %20 = arith.mulf %19, %16 : vector<2x64xf32>
      %21 = arith.select %18, %16, %20 : vector<2x64xi1>, vector<2x64xf32>
      %c0_16 = arith.constant 0 : index
      %c0_17 = arith.constant 0 : index
      %22 = vector.load %arg4[%c0_16, %c0_17] : memref<1x64xf32, #tpu.memory_space<vmem>>, vector<1x64xf32>
      %23 = vector.broadcast %22 : vector<1x64xf32> to vector<2x64xf32>
      %24 = arith.mulf %21, %23 : vector<2x64xf32>
      %cst_18 = arith.constant dense<0.000000e+00> : vector<2xf32>
      %25 = vector.multi_reduction <add>, %24, %cst_18 [1] : vector<2x64xf32> to vector<2xf32>
      %26 = vector.shape_cast %25 : vector<2xf32> to vector<2x1xf32>
      %c0_19 = arith.constant 0 : index
      %c0_20 = arith.constant 0 : index
      %27 = memref.load %arg5[%c0_19, %c0_20] : memref<1x1xf32, #tpu.memory_space<smem>>
      %28 = vector.broadcast %27 : f32 to vector<2x1xf32>
      %29 = arith.addf %26, %28 : vector<2x1xf32>
      %cst_21 = arith.constant 0.000000e+00 : f32
      %30 = vector.broadcast %cst_21 : f32 to vector<2x1xf32>
      %31 = arith.maximumf %29, %30 : vector<2x1xf32>
      %32 = math.absf %29 : vector<2x1xf32>
      %cst_22 = arith.constant 0.000000e+00 : f32
      %33 = vector.broadcast %cst_22 : f32 to vector<2x1xf32>
      %34 = arith.subf %33, %32 : vector<2x1xf32>
      %35 = math.exp %34 : vector<2x1xf32>
      %36 = math.log1p %35 : vector<2x1xf32>
      %37 = arith.addf %31, %36 : vector<2x1xf32>
      %cst_23 = arith.constant -1.000000e+00 : f32
      %38 = vector.broadcast %cst_23 : f32 to vector<2x1xf32>
      %39 = arith.mulf %38, %37 : vector<2x1xf32>
      %40 = vector.shape_cast %39 : vector<2x1xf32> to vector<1x2x1xf32>
      %cst_24 = arith.constant dense<0.000000e+00> : vector<1xf32>
      %41 = vector.multi_reduction <add>, %40, %cst_24 [1, 2] : vector<1x2x1xf32> to vector<1xf32>
      %42 = vector.shape_cast %41 : vector<1xf32> to vector<1x1x1xf32>
      %43 = vector.extract %42[0, 0, 0] : f32 from vector<1x1x1xf32>
      %cst_25 = arith.constant 2.000000e+00 : f32
      %44 = arith.divf %43, %cst_25 : f32
      %c0_26 = arith.constant 0 : index
      %c0_27 = arith.constant 0 : index
      %45 = memref.load %arg6[%c0_26, %c0_27] : memref<1x1xf32, #tpu.memory_space<smem>>
      memref.store %44, %arg6[%c0_26, %c0_27] : memref<1x1xf32, #tpu.memory_space<smem>>
    } else {
    }
    return
  }
  func.func @transform_0(%arg0: i32) -> (i32, i32) {
    %c0_i32 = arith.constant 0 : i32
    %c0_i32_0 = arith.constant 0 : i32
    %c0_i32_1 = arith.constant 0 : i32
    return %c0_i32, %c0_i32_0 : i32, i32
  }
  func.func @transform_1(%arg0: i32) -> (i32, i32) {
    %c0_i32 = arith.constant 0 : i32
    %c0_i32_0 = arith.constant 0 : i32
    return %arg0, %c0_i32 : i32, i32
  }
  func.func @transform_2(%arg0: i32) -> (i32, i32) {
    %c0_i32 = arith.constant 0 : i32
    %c0_i32_0 = arith.constant 0 : i32
    %c0_i32_1 = arith.constant 0 : i32
    return %c0_i32, %c0_i32_0 : i32, i32
  }
  func.func @transform_3(%arg0: i32) -> (i32, i32) {
    %c0_i32 = arith.constant 0 : i32
    %c0_i32_0 = arith.constant 0 : i32
    %c0_i32_1 = arith.constant 0 : i32
    return %c0_i32, %c0_i32_0 : i32, i32
  }
  func.func @transform_4(%arg0: i32) -> (i32, i32) {
    %c0_i32 = arith.constant 0 : i32
    %c0_i32_0 = arith.constant 0 : i32
    %c0_i32_1 = arith.constant 0 : i32
    return %c0_i32, %c0_i32_0 : i32, i32
  }
  func.func @transform_5(%arg0: i32) -> (i32, i32) {
    %c0_i32 = arith.constant 0 : i32
    %c0_i32_0 = arith.constant 0 : i32
    %c0_i32_1 = arith.constant 0 : i32
    return %c0_i32, %c0_i32_0 : i32, i32
  }
}

</mosaic_0001>

<bundles_post_ra>
// kernel: tpu_custom_call.1
= control target key start
LH: loop header
LB: loop body
LE: loop exit
PB: predicated region body
PF: predicated region fallthrough
CT: control target
= control target key end

     0   :  { %v38_v28 = vlaneseq  ;;  %v1072_v36 = vmov 1983009808   ;;  %s1324_s0 = inlined_call_operand.vmem [shape: f32[2,1024], index: 0, kind: input, shape index: {}]   ;;  %s1325_s1 = inlined_call_operand.vmem [shape: bf16[1024,64], index: 1, kind: input, shape index: {}]   ;;  %s1326_s2 = inlined_call_operand.vmem [shape: f32[1,64], index: 2, kind: input, shape index: {}]   ;;  %s1327_s3 = inlined_call_operand.vmem [shape: f32[1,64], index: 3, kind: input, shape index: {}]   ;;  %s1328_s4 = inlined_call_operand.<no memory space> [shape: f32[1,1], index: 4, kind: input, shape index: {}]   ;;  %s1329_s5 = inlined_call_operand.hbm [shape: f32[1,1], index: 5, kind: output, shape index: {}]  }
   0x1   :  { %v992_v0 = vld [vmem:[%s1325_s1 + $0x78] sm:$0xff]   ;;  %v996_v4 = vld [vmem:[%s1325_s1 + $0x70] sm:$0xff]   ;;  %v1000_v8 = vld [vmem:[%s1325_s1 + $0x68] sm:$0xff]   ;;  %v36_v37 = vunpack.c.l.s4 %v1072_v36 }
   0x2   :  { %v993_v1 = vld [vmem:[%s1325_s1 + $0xf8] sm:$0xff]   ;;  %899 = vmatprep.subr.bf16.mxu0 %v992_v0  ;;  %v997_v5 = vld [vmem:[%s1325_s1 + $0xf0] sm:$0xff]   ;;  %v1001_v9 = vld [vmem:[%s1325_s1 + $0xe8] sm:$0xff]   ;;  %v39_v33 = vshrl.u32 %v38_v28, 7 }
   0x3   :  { %v994_v2 = vld [vmem:[%s1325_s1 + $0x38] sm:$0xff]   ;;  %921 = vmatprep.subr.bf16.mxu1 %v993_v1  ;;  %v998_v6 = vld [vmem:[%s1325_s1 + $0x30] sm:$0xff]   ;;  %v1002_v10 = vld [vmem:[%s1325_s1 + $0x28] sm:$0xff]   ;;  %v37_v39 = vunpack.c.0.s8 %v36_v37 }
   0x4   :  { %v995_v3 = vld [vmem:[%s1325_s1 + $0xb8] sm:$0xff]   ;;  %900 = vmatpush3.bf16.msra.mxu0 %v994_v2  ;;  %v999_v7 = vld [vmem:[%s1325_s1 + $0xb0] sm:$0xff]   ;;  %v1003_v11 = vld [vmem:[%s1325_s1 + $0xa8] sm:$0xff]  }
   0x5   :  { %922 = vmatpush3.bf16.msra.mxu1 %v995_v3  ;;  %901 = vmatprep.subr.bf16.mxu0 %v996_v4  ;;  %v1004_v12 = vld [vmem:[%s1325_s1 + $0x60] sm:$0xff]   ;;  %v1008_v16 = vld [vmem:[%s1325_s1 + $0x58] sm:$0xff]   ;;  %v1012_v20 = vld [vmem:[%s1325_s1 + $0x50] sm:$0xff]   ;;  %v1210_v41 = vsub.s32 %v37_v39, %v39_v33 }
   0x6   :  { %923 = vmatprep.subr.bf16.mxu1 %v997_v5  ;;  %v1005_v13 = vld [vmem:[%s1325_s1 + $0xe0] sm:$0xff]   ;;  %v1009_v17 = vld [vmem:[%s1325_s1 + $0xd8] sm:$0xff]   ;;  %v1013_v21 = vld [vmem:[%s1325_s1 + $0xd0] sm:$0xff]  }
   0x7   :  { %v1006_v14 = vld [vmem:[%s1325_s1 + $0x20] sm:$0xff]   ;;  %v1010_v18 = vld [vmem:[%s1325_s1 + $0x18] sm:$0xff]   ;;  %v1014_v22 = vld [vmem:[%s1325_s1 + $0x10] sm:$0xff]  }
   0x8   :  { %902 = vmatpush3.bf16.msra.mxu0 %v998_v6  ;;  %v1007_v15 = vld [vmem:[%s1325_s1 + $0xa0] sm:$0xff]   ;;  %v1011_v19 = vld [vmem:[%s1325_s1 + $0x98] sm:$0xff]   ;;  %v1015_v23 = vld [vmem:[%s1325_s1 + $0x90] sm:$0xff]  }
   0x9   :  { %924 = vmatpush3.bf16.msra.mxu1 %v999_v7  ;;  %903 = vmatprep.subr.bf16.mxu0 %v1000_v8  ;;  %v1016_v24 = vld [vmem:[%s1325_s1 + $0x48] sm:$0xff]   ;;  %v1020_v29 = vld [vmem:[%s1325_s1 + $0x40] sm:$0xff]   ;;  %v1025_v35 = vld [vmem:[%s1325_s1 + $0x178] sm:$0xff]  }
   0xa   :  { %925 = vmatprep.subr.bf16.mxu1 %v1001_v9  ;;  %v1017_v25 = vld [vmem:[%s1325_s1 + $0xc8] sm:$0xff]   ;;  %v1021_v30 = vld [vmem:[%s1325_s1 + $0xc0] sm:$0xff]   ;;  %v1026_v38 = vld [vmem:[%s1325_s1 + $0x1f8] sm:$0xff]  }
   0xb   :  { %v1018_v26 = vld [vmem:[%s1325_s1 + $0x8] sm:$0xff]   ;;  %v1022_v31 = vld [vmem:[%s1325_s1] sm:$0xff]   ;;  %v1027_v46 = vld [vmem:[%s1325_s1 + $0x138] sm:$0xff]  }
   0xc   :  { %904 = vmatpush3.bf16.msra.mxu0 %v1002_v10  ;;  %v1019_v27 = vld [vmem:[%s1325_s1 + $0x88] sm:$0xff]   ;;  %v1023_v32 = vld [vmem:[%s1325_s1 + $0x80] sm:$0xff]   ;;  %v1028_v49 = vld [vmem:[%s1325_s1 + $0x1b8] sm:$0xff]  }
   0xd   :  { %926 = vmatpush3.bf16.msra.mxu1 %v1003_v11  ;;  %905 = vmatprep.subr.bf16.mxu0 %v1004_v12  ;;  %v29_v34 = vld [vmem:[%s1324_s0] sm:$0xff]  ;;  %v1029_v52 = vld [vmem:[%s1325_s1 + $0x170] sm:$0xff]   ;;  %v1033_v56 = vld [vmem:[%s1325_s1 + $0x168] sm:$0xff]  }
   0xe   :  { %927 = vmatprep.subr.bf16.mxu1 %v1005_v13  ;;  %v34_v40 = vcombine.high %v29_v34, %v29_v34  ;;  %v41_v42 = vrot.slane %v29_v34, %v1210_v41  ;;  %v1030_v53 = vld [vmem:[%s1325_s1 + $0x1f0] sm:$0xff]   ;;  %v1034_v57 = vld [vmem:[%s1325_s1 + $0x1e8] sm:$0xff]   ;;  %v1037_v60 = vld [vmem:[%s1325_s1 + $0x160] sm:$0xff]  }
   0xf   :  { %v1031_v54 = vld [vmem:[%s1325_s1 + $0x130] sm:$0xff]   ;;  %v1035_v58 = vld [vmem:[%s1325_s1 + $0x128] sm:$0xff]   ;;  %v1038_v61 = vld [vmem:[%s1325_s1 + $0x1e0] sm:$0xff]  }
  0x10   :  { %906 = vmatpush3.bf16.msra.mxu0 %v1006_v14  ;;  %v48_v43 = vrot.slane %v34_v40, %v1210_v41  ;;  %v49_v44 = vcombine.high %v41_v42, %v41_v42  ;;  %v76_v47 = vpack.c.bf16 %v41_v42, %v41_v42  ;;  %v1032_v55 = vld [vmem:[%s1325_s1 + $0x1b0] sm:$0xff]   ;;  %v1036_v59 = vld [vmem:[%s1325_s1 + $0x1a8] sm:$0xff]   ;;  %v1039_v62 = vld [vmem:[%s1325_s1 + $0x120] sm:$0xff]  }
  0x11   :  { %928 = vmatpush3.bf16.msra.mxu1 %v1007_v15  ;;  %907 = vmatprep.subr.bf16.mxu0 %v1008_v16  ;;  %v1040_v63 = vld [vmem:[%s1325_s1 + $0x1a0] sm:$0xff]   ;;  %v1041_v0 = vld [vmem:[%s1325_s1 + $0x158] sm:$0xff]   ;;  %v1045_v4 = vld [vmem:[%s1325_s1 + $0x150] sm:$0xff]  }
  0x12   :  { %929 = vmatprep.subr.bf16.mxu1 %v1009_v17  ;;  %v50_v45 = vcombine.high %v48_v43, %v48_v43  ;;  %v78_v48 = vpack.c.bf16 %v48_v43, %v48_v43  ;;  %v77_v50 = vpack.c.bf16 %v49_v44, %v49_v44  ;;  %v1042_v1 = vld [vmem:[%s1325_s1 + $0x1d8] sm:$0xff]   ;;  %v1046_v5 = vld [vmem:[%s1325_s1 + $0x1d0] sm:$0xff]   ;;  %v1049_v8 = vld [vmem:[%s1325_s1 + $0x148] sm:$0xff]  }
  0x13   :  { %v1043_v2 = vld [vmem:[%s1325_s1 + $0x118] sm:$0xff]   ;;  %v1047_v6 = vld [vmem:[%s1325_s1 + $0x110] sm:$0xff]   ;;  %v1050_v9 = vld [vmem:[%s1325_s1 + $0x1c8] sm:$0xff]  }
  0x14   :  { %908 = vmatpush3.bf16.msra.mxu0 %v1010_v18  ;;  %v79_v51 = vpack.c.bf16 %v50_v45, %v50_v45  ;;  %628 = vmatprep.mubr.bf16.mxu0 %v77_v50  ;;  %v1044_v3 = vld [vmem:[%s1325_s1 + $0x198] sm:$0xff]   ;;  %v1048_v7 = vld [vmem:[%s1325_s1 + $0x190] sm:$0xff]   ;;  %v30_v10 = vld [vmem:[%s1324_s0 + $0x8] sm:$0xff] }
  0x15   :  { %930 = vmatpush3.bf16.msra.mxu1 %v1011_v19  ;;  %909 = vmatprep.subr.bf16.mxu0 %v1012_v20 }
  0x16   :  { %931 = vmatprep.subr.bf16.mxu1 %v1013_v21  ;;  %668 = vmatprep.mubr.bf16.mxu1 %v79_v51 }
  0x18   :  { %910 = vmatpush3.bf16.msra.mxu0 %v1014_v22 }
  0x19   :  { %932 = vmatpush3.bf16.msra.mxu1 %v1015_v23  ;;  %911 = vmatprep.subr.bf16.mxu0 %v1016_v24 }
  0x1a   :  { %933 = vmatprep.subr.bf16.mxu1 %v1017_v25 }
  0x1c   :  { %912 = vmatpush3.bf16.msra.mxu0 %v1018_v26 }
  0x1d   :  { %934 = vmatpush3.bf16.msra.mxu1 %v1019_v27  ;;  %913 = vmatprep.subr.bf16.mxu0 %v1020_v29 }
  0x1e   :  { %935 = vmatprep.subr.bf16.mxu1 %v1021_v30 }
  0x20   :  { %914 = vmatpush3.bf16.msra.mxu0 %v1022_v31 }
  0x21   :  { %936 = vmatpush3.bf16.msra.mxu1 %v1023_v32  ;;  %943 = vmatprep.subr.bf16.mxu0 %v1025_v35 }
  0x22   :  { %965 = vmatprep.subr.bf16.mxu1 %v1026_v38 }
  0x23   :  { %629 = vmatmul.mubr.bf16.vlgmr.msra.gmra.mxu0 %v76_v47 }
  0x24   :  { %669 = vmatmul.mubr.bf16.vlgmr.msra.gmra.mxu1 %v78_v48  ;;  %944 = vmatpush3.bf16.msra.mxu0 %v1027_v46 }
  0x25   :  { %966 = vmatpush3.bf16.msra.mxu1 %v1028_v49  ;;  %945 = vmatprep.subr.bf16.mxu0 %v1029_v52 }
  0x26   :  { %967 = vmatprep.subr.bf16.mxu1 %v1030_v53 }
  0x28   :  { %946 = vmatpush3.bf16.msra.mxu0 %v1031_v54 }
  0x29   :  { %968 = vmatpush3.bf16.msra.mxu1 %v1032_v55  ;;  %947 = vmatprep.subr.bf16.mxu0 %v1033_v56 }
  0x2a   :  { %969 = vmatprep.subr.bf16.mxu1 %v1034_v57 }
  0x2c   :  { %948 = vmatpush3.bf16.msra.mxu0 %v1035_v58 }
  0x2d   :  { %970 = vmatpush3.bf16.msra.mxu1 %v1036_v59  ;;  %949 = vmatprep.subr.bf16.mxu0 %v1037_v60 }
  0x2e   :  { %971 = vmatprep.subr.bf16.mxu1 %v1038_v61 }
  0x30   :  { %950 = vmatpush3.bf16.msra.mxu0 %v1039_v62 }
  0x31   :  { %972 = vmatpush3.bf16.msra.mxu1 %v1040_v63  ;;  %951 = vmatprep.subr.bf16.mxu0 %v1041_v0 }
  0x32   :  { %973 = vmatprep.subr.bf16.mxu1 %v1042_v1 }
  0x34   :  { %952 = vmatpush3.bf16.msra.mxu0 %v1043_v2 }
  0x35   :  { %974 = vmatpush3.bf16.msra.mxu1 %v1044_v3  ;;  %953 = vmatprep.subr.bf16.mxu0 %v1045_v4 }
  0x36   :  { %975 = vmatprep.subr.bf16.mxu1 %v1046_v5 }
  0x37   :  { %11 = vsyncpa [#allocation5], 0  ;;  %v58_v11 = vrot.slane %v30_v10, %v1210_v41  ;;  %v51_v12 = vcombine.high %v30_v10, %v30_v10  ;;  %v1051_v13 = vld [vmem:[%s1325_s1 + $0x108] sm:$0xff]   ;;  %v1053_v17 = vld [vmem:[%s1325_s1 + $0x140] sm:$0xff]   ;;  %vm27_vm0 = vcmask 517120   ;;  %v1073_v26 = vmov 0.0  }
  0x38   :  { %954 = vmatpush3.bf16.msra.mxu0 %v1047_v6  ;;  %v1052_v14 = vld [vmem:[%s1325_s1 + $0x188] sm:$0xff]   ;;  %v1054_v18 = vld [vmem:[%s1325_s1 + $0x1c0] sm:$0xff]   ;;  %28 = vst.msk [vmem:[#allocation2] sm:$0x3] %vm27_vm0, %v1073_v26  ;;  %v786_v60 = vstv %s1328_s4  ;;  %vm804_vm3 = vcmask 1024   ;;  %s1074_s4 = smov [#allocation4]  }
  0x39   :  { %976 = vmatpush3.bf16.msra.mxu1 %v1048_v7  ;;  %v66_v15 = vcombine.high %v58_v11, %v58_v11  ;;  %v65_v16 = vrot.slane %v51_v12, %v1210_v41  ;;  %955 = vmatprep.subr.bf16.mxu0 %v1049_v8  ;;  %v1055_v21 = vld [vmem:[%s1325_s1 + $0x100] sm:$0xff]   ;;  %v80_v24 = vpack.c.bf16 %v58_v11, %v58_v11 }
  0x3a   :  { %977 = vmatprep.subr.bf16.mxu1 %v1050_v9  ;;  %v1056_v22 = vld [vmem:[%s1325_s1 + $0x180] sm:$0xff]  }
  0x3b   :  { %v81_v19 = vpack.c.bf16 %v66_v15, %v66_v15  ;;  %v67_v20 = vcombine.high %v65_v16, %v65_v16  ;;  %v82_v25 = vpack.c.bf16 %v65_v16, %v65_v16  ;;  %v897_v52 = vld [vmem:[%s1326_s2] ss:$0 sm:$0xff] }
  0x3c   :  { %956 = vmatpush3.bf16.msra.mxu0 %v1051_v13  ;;  %v898_v56 = vld [vmem:[%s1327_s3] ss:$0 sm:$0xff] }
  0x3d   :  { %978 = vmatpush3.bf16.msra.mxu1 %v1052_v14  ;;  %v83_v23 = vpack.c.bf16 %v67_v20, %v67_v20  ;;  %957 = vmatprep.subr.bf16.mxu0 %v1053_v17 }
  0x3e   :  { %979 = vmatprep.subr.bf16.mxu1 %v1054_v18  ;;  %708 = vmatprep.mubr.bf16.mxu0 %v81_v19 }
  0x3f   :  { %748 = vmatprep.mubr.bf16.mxu1 %v83_v23  ;;  %v31_v49 = vld [vmem:[#allocation2] sm:$0x3] }
  0x40   :  { %958 = vmatpush3.bf16.msra.mxu0 %v1055_v21 }
  0x41   :  { %980 = vmatpush3.bf16.msra.mxu1 %v1056_v22 }
  0x43   :  { %709 = vmatmul.mubr.bf16.vlgmr.msra.gmra.mxu0 %v80_v24 }
  0x44   :  { %749 = vmatmul.mubr.bf16.vlgmr.msra.gmra.mxu1 %v82_v25 }
  0xe3   :  { %v915_v27 = vpop.f32.mrf.mxu0 }
  0xe4   :  { %v937_v28 = vpop.f32.mrf.mxu1 }
  0xe5   :  { %v916_v29 = vpop.f32.mrf.mxu0 }
  0xe6   :  { %v938_v30 = vpop.f32.mrf.mxu1  ;;  %v917_v35 = vadd.f32 %v916_v29, %v915_v27 }
  0xe7   :  { %v918_v31 = vpop.f32.mrf.mxu0  ;;  %v939_v36 = vadd.f32 %v938_v30, %v937_v28 }
  0xe8   :  { %v940_v32 = vpop.f32.mrf.mxu1 }
  0xe9   :  { %v919_v33 = vpop.f32.mrf.mxu0  ;;  %v671_v41 = vadd.f32 %v939_v36, %v917_v35 }
  0xea   :  { %v941_v34 = vpop.f32.mrf.mxu1 }
 0x103   :  { %v959_v37 = vpop.f32.mrf.mxu0 }
 0x104   :  { %v981_v38 = vpop.f32.mrf.mxu1 }
 0x105   :  { %v960_v39 = vpop.f32.mrf.mxu0 }
 0x106   :  { %v982_v40 = vpop.f32.mrf.mxu1  ;;  %v961_v42 = vadd.f32 %v960_v39, %v959_v37 }
 0x107   :  { %v962_v43 = vpop.f32.mrf.mxu0  ;;  %v983_v46 = vadd.f32 %v982_v40, %v981_v38 }
 0x108   :  { %v984_v44 = vpop.f32.mrf.mxu1  ;;  %v711_v45 = vadd.f32 %v961_v42, %v671_v41 }
 0x109   :  { %v963_v47 = vpop.f32.mrf.mxu0 }
 0x10a   :  { %v985_v48 = vpop.f32.mrf.mxu1  ;;  %v751_v50 = vadd.f32 %v983_v46, %v711_v45 }
 0x10c   :  { %v756_v51 = vadd.f32 %v751_v50, %v31_v49 }
 0x10e   :  { %758 = vst.msk [vmem:[#allocation2] sm:$0x3] %vm27_vm0, %v756_v51 }
 0x115   :  { %v762_v53 = vld [vmem:[#allocation2] sm:$0x3] }
 0x116   :  { %v770_v54 = vadd.f32 %v897_v52, %v762_v53 }
 0x118   :  { %vm771_vm1 = vcmp.gt.f32.partialorder %v770_v54, 0.0  ;;  %v772_v55 = vmul.f32 0.2, %v770_v54 }
 0x11a   :  { %v773_v57 = vsel %vm771_vm1, %v770_v54, %v772_v55 }
 0x11b   :  { %v781_v58 = vmul.f32 %v898_v56, %v773_v57 }
 0x11d   :  { %v782_v59 = vsel %vm27_vm0, %v781_v58, 0.0 }
 0x11e   :  { %783 = vadd.xlane.f32.xlu0 %v782_v59 }
 0x1a7   :  { %v784_v61 = vpop.xlane.xlu0 %783 }
 0x1a8   :  { %v787_v62 = vadd.f32 %v786_v60, %v784_v61 }
 0x1aa   :  { %v789_v63 = vand.u32 2147483647, %v787_v62  ;;  %v788_v10 = vmax.f32 %v787_v62, 0.0 }
 0x1ac   :  { %v790_v0 = vsub.f32 0.0, %v789_v63 }
 0x1ae   :  { %v791_v1 = vmul.f32 1.442695, %v790_v0 }
 0x1b0   :  { %1058 = vpow2.f32 %v791_v1 }
 0x1bd   :  { %v1059_v2 = vpop.eup %1058 }
 0x1be   :  { %v793_v3 = vadd.f32 1.0, %v1059_v2  ;;  %v796_v4 = vmul.f32 -0.5, %v1059_v2  ;;  %v799_v6 = vand.u32 2147483647, %v1059_v2 }
 0x1c0   :  { %1060 = vlog2.f32 %v793_v3  ;;  %v797_v5 = vadd.f32 1.0, %v796_v4  ;;  %vm800_vm2 = vcmp.lt.f32.partialorder %v799_v6, 0.0004427343 }
 0x1c2   :  { %v798_v9 = vmul.f32 %v1059_v2, %v797_v5 }
 0x1cd   :  { %v1061_v7 = vpop.eup %1060 }
 0x1ce   :  { %v795_v8 = vmul.f32 0.6931472, %v1061_v7 }
 0x1d0   :  { %v801_v11 = vsel %vm800_vm2, %v798_v9, %v795_v8 }
 0x1d1   :  { %v802_v12 = vadd.f32 %v801_v11, %v788_v10 }
 0x1d3   :  { %v803_v13 = vmul.f32 -1.0, %v802_v12 }
 0x1d5   :  { %v805_v14 = vsel %vm804_vm3, %v803_v13, 0.0 }
 0x1d6   :  { %806 = vadd.xlane.f32.xlu0 %v805_v14 }
 0x25f   :  { %v807_v15 = vpop.xlane.xlu0 %806 }
 0x260   :  { %v808_v16 = vrot.slane %v807_v15, 4 }
 0x262   :  { %v809_v17 = vadd.f32 %v808_v16, %v807_v15 }
 0x264   :  { %v810_v18 = vrot.slane %v809_v17, 2 }
 0x266   :  { %v811_v19 = vadd.f32 %v810_v18, %v809_v17 }
 0x268   :  { %v812_v20 = vrot.slane %v811_v19, 1 }
 0x26a   :  { %v813_v21 = vadd.f32 %v812_v20, %v811_v19 }
 0x26c   :  { %987 = vpush %v813_v21 }
 0x29d   :  { %s988_s2 = spop %987 }
 0x29e   :  { %s817_s3 = smul.f32 0.5, %s988_s2 }
 0x2a0   :  { %819 = sst [smem:[#allocation4]] %s817_s3 }
 0x2a1   :  { %827 = dma.smem_to_hbm %s1074_s4, 16, %s1329_s5, [#allocation5]  }
 0x2a2   :  { %1070 = dma.done.wait [#allocation5], 16  }
 0x2a3   :  { %1071 = vsyncadd [#allocation5], 4294967280 }
 0x2a4   :  { %831 = sfence }
 0x2a5   :  { %832 = vsyncpa [#allocation5], 1 }

</bundles_post_ra>
